<compile_context>
chip_gen: v6e
topology: v6e:2x2x1
jax: 0.10.0
libtpu: 0.0.40
codegen_flags: <defaults>
</compile_context>

<pallas_src>
import math
from functools import partial

import jax
import jax.numpy as jnp
from jax.experimental import pallas as pl
from jax.experimental.pallas import tpu as pltpu


# ----------------------------- Pallas kernels ------------------------------ #
def _conv_bn_act_kernel(x_ref, w_ref, b_ref, *rest, K, stride, L_out, relu,
                        has_residual):
    """K-tap conv as K shifted MXU dots, fused BN bias, optional residual+ReLU.

    x_ref : (1, n_ph, Lph, Cin)  bf16   phase-decomposed padded input slab
    w_ref : (K, Cin, Cout)       bf16   BN-scale-folded per-tap weights (resident)
    b_ref : (1, Cout)            f32    folded BN bias (resident)
    rest  : [r_ref (1, L_out, Cout) bf16,]  o_ref (1, L_out, Cout) bf16
    """
    if has_residual:
        r_ref, o_ref = rest
    else:
        (o_ref,) = rest
    Cout = o_ref.shape[-1]

    acc = jnp.zeros((L_out, Cout), jnp.float32)
    for k in range(K):                       # K is 1, 3 or 7 -> static unroll
        j = k % stride                       # phase
        q = k // stride                      # shift inside the phase
        xk = x_ref[0, j, q:q + L_out, :]     # (L_out, Cin) bf16, contiguous slice
        acc = acc + jnp.dot(xk, w_ref[k], preferred_element_type=jnp.float32)

    y = acc + b_ref[...]                     # folded BN bias (scale already in w)
    if has_residual:
        y = y + r_ref[0].astype(jnp.float32)
    if relu:
        y = jnp.maximum(y, 0.0)
    o_ref[0] = y.astype(o_ref.dtype)


def _maxpool_kernel(x_ref, o_ref, *, L_out):
    """MaxPool1d(kernel=3, stride=2, pad=1) with the stride-2 subsample fused.

    x_ref: (1, 2, L_out+1, C)  phase-decomposed (-inf padded) input
    o_ref: (1, L_out, C)
    """
    m = jnp.maximum(x_ref[0, 0, 0:L_out, :], x_ref[0, 1, 0:L_out, :])
    o_ref[0] = jnp.maximum(m, x_ref[0, 0, 1:L_out + 1, :])


def _head_kernel(x_ref, w_ref, b_ref, o_ref):
    """AdaptiveAvgPool1d(1) (mean over L) + Linear, fused, per sample."""
    pooled = jnp.mean(x_ref[0].astype(jnp.float32), axis=0, keepdims=True)  # (1, C)
    o_ref[0] = jnp.dot(pooled, w_ref[...],
                       preferred_element_type=jnp.float32) + b_ref[...]


# ------------------------------ glue helpers -------------------------------- #
def _phases(xp, stride, n_ph, Lph):
    """Split padded [N, Lp, C] into `n_ph` stride-phased views of length Lph.

    phase_j[m] = xp[m*stride + j].  Zero-padded tails are never read by the
    kernel (reads stay inside the valid conv window by construction).
    Returns [N, n_ph, Lph, C].
    """
    outs = []
    for j in range(n_ph):
        pj = xp[:, j::stride, :]
        cur = pj.shape[1]
        if cur < Lph:
            pj = jnp.pad(pj, ((0, 0), (0, Lph - cur), (0, 0)))
        elif cur > Lph:
            pj = pj[:, :Lph, :]
        outs.append(pj)
    return jnp.stack(outs, axis=1)


def conv1d_bn_act(x, w, scale, bias, *, stride, padding, relu, residual=None):
    """x: [N, L, Cin], w: [Cout, Cin, K] (PyTorch layout). Returns bf16 [N, L_out, Cout]."""
    N, L, Cin = x.shape
    Cout, Cin_w, K = w.shape
    assert Cin == Cin_w
    L_out = (L + 2 * padding - K) // stride + 1

    # phase-decomposed input slab (avoids materialized im2col and in-kernel
    # strided reads); only the phases actually referenced by a tap are built.
    n_ph = min(stride, K)
    Lph = L_out + (K - 1) // stride
    xp = jnp.pad(x, ((0, 0), (padding, padding), (0, 0)))
    ph = _phases(xp, stride, n_ph, Lph).astype(jnp.bfloat16)      # [N, n_ph, Lph, Cin]

    # fold BN scale into the weight columns; per-tap layout [K, Cin, Cout]
    w_taps = (jnp.transpose(w, (2, 1, 0)) *
              scale.astype(jnp.float32)[None, None, :]).astype(jnp.bfloat16)
    b2 = bias.reshape(1, Cout).astype(jnp.float32)

    in_specs = [
        pl.BlockSpec((1, n_ph, Lph, Cin), lambda n: (n, 0, 0, 0)),   # per-sample slab
        pl.BlockSpec((K, Cin, Cout), lambda n: (0, 0, 0)),           # resident weights
        pl.BlockSpec((1, Cout), lambda n: (0, 0)),                   # resident bias
    ]
    args = [ph, w_taps, b2]
    if residual is not None:
        in_specs.append(pl.BlockSpec((1, L_out, Cout), lambda n: (n, 0, 0)))
        args.append(residual)

    flops = 2 * N * L_out * Cin * K * Cout
    out_bytes = N * L_out * Cout * 2
    bytes_accessed = (ph.size * 2 + w_taps.size * 2 + b2.size * 4 + out_bytes
                      + (out_bytes if residual is not None else 0))

    out = pl.pallas_call(
        partial(_conv_bn_act_kernel, K=K, stride=stride, L_out=L_out,
                relu=relu, has_residual=residual is not None),
        out_shape=jax.ShapeDtypeStruct((N, L_out, Cout), jnp.bfloat16),
        grid=(N,),
        in_specs=in_specs,
        out_specs=pl.BlockSpec((1, L_out, Cout), lambda n: (n, 0, 0)),
        compiler_params=pltpu.CompilerParams(
            dimension_semantics=("parallel",),
            vmem_limit_bytes=48 * 1024 * 1024),
        cost_estimate=pl.CostEstimate(flops=flops, transcendentals=0,
                                      bytes_accessed=bytes_accessed),
    )(*args)
    return out


def maxpool3s2(x):
    """PyTorch MaxPool1d(kernel_size=3, stride=2, padding=1) on [N, L, C]."""
    N, L, C = x.shape
    L_out = (L - 1) // 2 + 1
    xp = jnp.pad(x, ((0, 0), (1, 1), (0, 0)), constant_values=-1e30)
    ph = _phases(xp, 2, 2, L_out + 1)                               # [N, 2, L_out+1, C]
    return pl.pallas_call(
        partial(_maxpool_kernel, L_out=L_out),
        out_shape=jax.ShapeDtypeStruct((N, L_out, C), x.dtype),
        grid=(N,),
        in_specs=[pl.BlockSpec((1, 2, L_out + 1, C), lambda n: (n, 0, 0, 0))],
        out_specs=pl.BlockSpec((1, L_out, C), lambda n: (n, 0, 0)),
        compiler_params=pltpu.CompilerParams(dimension_semantics=("parallel",)),
    )(ph)


def head(x, w_fc, b_fc):
    """AdaptiveAvgPool1d(1) + Linear. x: [N, L, 512], w_fc: [num_classes, 512]."""
    N, L, C = x.shape
    Cout = w_fc.shape[0]
    wt = w_fc.T.astype(jnp.float32)                                 # [512, Cout], resident
    b2 = b_fc.reshape(1, Cout).astype(jnp.float32)
    out = pl.pallas_call(
        _head_kernel,
        out_shape=jax.ShapeDtypeStruct((N, 1, Cout), jnp.float32),
        grid=(N,),
        in_specs=[pl.BlockSpec((1, L, C), lambda n: (n, 0, 0)),
                  pl.BlockSpec((C, Cout), lambda n: (0, 0)),
                  pl.BlockSpec((1, Cout), lambda n: (0, 0))],
        out_specs=pl.BlockSpec((1, 1, Cout), lambda n: (n, 0, 0)),
        compiler_params=pltpu.CompilerParams(dimension_semantics=("parallel",)),
    )(x, wt, b2)
    return out.reshape(N, Cout)


def resnet_block(x, p):
    s = p["stride"]
    h = conv1d_bn_act(x, p["w1"], *p["bn1"], stride=s, padding=1, relu=True)
    if p["ws"] is not None:
        sc = conv1d_bn_act(x, p["ws"], *p["bns"], stride=s, padding=0, relu=False)
    else:
        sc = x
    # conv2 + bn2 + residual add + ReLU fused in one kernel (residual passed
    # directly with the output tile BlockSpec, no glue reshape/pad).
    return conv1d_bn_act(h, p["w2"], *p["bn2"], stride=1, padding=1,
                         relu=True, residual=sc)


def resnet_ecg_forward(x_ncl, params):
    x = jnp.transpose(x_ncl, (0, 2, 1))                    # NCL -> NLC
    x = conv1d_bn_act(x, params["conv1_w"], *params["bn1"],
                      stride=2, padding=3, relu=True)
    x = maxpool3s2(x)
    for layer in params["layers"]:
        for blk in layer:
            x = resnet_block(x, blk)
    return head(x, params["fc_w"], params["fc_b"])


# --------------------------- deterministic params --------------------------- #
def init_params(key, num_leads, num_classes, num_blocks=(2, 2, 2, 2)):
    keys = iter(jax.random.split(key, 256))

    def conv_w(cout, cin, k):
        fan_in = cin * k
        return jax.random.normal(next(keys), (cout, cin, k), jnp.float32) / math.sqrt(fan_in)

    def bn_fold(c):
        # Inference-mode BatchNorm folded to per-channel (scale, bias).
        gamma = 1.0 + 0.1 * jax.random.normal(next(keys), (c,), jnp.float32)
        beta = 0.1 * jax.random.normal(next(keys), (c,), jnp.float32)
        mean = 0.1 * jax.random.normal(next(keys), (c,), jnp.float32)
        var = 1.0 + 0.1 * jnp.abs(jax.random.normal(next(keys), (c,), jnp.float32))
        scale = gamma / jnp.sqrt(var + 1e-5)
        bias = beta - mean * scale
        return scale, bias

    params = {
        "conv1_w": conv_w(64, num_leads, 7),
        "bn1": bn_fold(64),
        "layers": [],
        "fc_w": jax.random.normal(next(keys), (num_classes, 512), jnp.float32) / math.sqrt(512),
        "fc_b": 0.01 * jax.random.normal(next(keys), (num_classes,), jnp.float32),
    }

    in_ch = 64
    for out_ch, first_stride, n_blk in zip((64, 128, 256, 512), (1, 2, 2, 2), num_blocks):
        layer = []
        strides = [first_stride] + [1] * (n_blk - 1)
        for s in strides:
            blk = {
                "stride": s,
                "w1": conv_w(out_ch, in_ch, 3),
                "bn1": bn_fold(out_ch),
                "w2": conv_w(out_ch, out_ch, 3),
                "bn2": bn_fold(out_ch),
                "ws": None,
                "bns": None,
            }
            if s != 1 or in_ch != out_ch:
                blk["ws"] = conv_w(out_ch, in_ch, 1)
                blk["bns"] = bn_fold(out_ch)
            layer.append(blk)
            in_ch = out_ch
        params["layers"].append(layer)
    return params


if __name__ == "__main__":
    key = jax.random.PRNGKey(0)
    k_x, k_p = jax.random.split(key)

    batch, num_leads, signal_length, num_classes = 2, 4, 64, 5
    x = jax.random.normal(k_x, (batch, num_leads, signal_length), jnp.float32)
    params = init_params(k_p, num_leads, num_classes)

    logits = resnet_ecg_forward(x, params)
    logits = jax.block_until_ready(logits)
    assert logits.shape == (batch, num_classes)
    assert bool(jnp.all(jnp.isfinite(logits)))
    print("KERNEL_OK")
</pallas_src>

<mosaic_0001>
module attributes {stable_mosaic.version = 11 : i64} {
  func.func @_conv_bn_act_kernel(%arg0: i32, %arg1: memref<1x2x35x4xbf16, #tpu.memory_space<vmem>>, %arg2: memref<7x4x64xbf16, #tpu.memory_space<vmem>>, %arg3: memref<1x64xf32, #tpu.memory_space<vmem>>, %arg4: memref<1x32x64xbf16, #tpu.memory_space<vmem>>) attributes {dimension_semantics = [#tpu.dimension_semantics<parallel>], iteration_bounds = array<i64: 2>, scalar_prefetch = 0 : i64, scratch_operands = 0 : i64, tpu.core_type = #tpu.core_type<tc>, window_params = [{transform_indices = @transform_0, window_bounds = array<i64: 1, 2, 35, 4>}, {pipeline_mode = #tpu.pipeline_mode<synchronous>, transform_indices = @transform_1, window_bounds = array<i64: 7, 4, 64>}, {pipeline_mode = #tpu.pipeline_mode<synchronous>, transform_indices = @transform_2, window_bounds = array<i64: 1, 64>}, {transform_indices = @transform_3, window_bounds = array<i64: 1, 32, 64>}]} {
    %cst = arith.constant 0.000000e+00 : f32
    %0 = vector.broadcast %cst : f32 to vector<32x64xf32>
    %c0 = arith.constant 0 : index
    %c0_0 = arith.constant 0 : index
    %c0_1 = arith.constant 0 : index
    %c0_2 = arith.constant 0 : index
    %1 = vector.load %arg1[%c0, %c0_0, %c0_1, %c0_2] : memref<1x2x35x4xbf16, #tpu.memory_space<vmem>>, vector<1x1x32x4xbf16>
    %2 = vector.shape_cast %1 : vector<1x1x32x4xbf16> to vector<32x4xbf16>
    %c0_3 = arith.constant 0 : index
    %c0_4 = arith.constant 0 : index
    %c0_5 = arith.constant 0 : index
    %3 = vector.load %arg2[%c0_3, %c0_4, %c0_5] : memref<7x4x64xbf16, #tpu.memory_space<vmem>>, vector<1x4x64xbf16>
    %4 = vector.shape_cast %3 : vector<1x4x64xbf16> to vector<4x64xbf16>
    %cst_6 = arith.constant dense<0.000000e+00> : vector<32x64xf32>
    %5 = tpu.matmul %2, %4, %cst_6 {dimension_numbers = #tpu.dot_dimension_numbers<[1], [0], [0], [1], [0, 0, 1, 1], [], []>} : vector<32x4xbf16>, vector<4x64xbf16>, vector<32x64xf32> -> vector<32x64xf32>
    %6 = arith.addf %0, %5 : vector<32x64xf32>
    %c0_7 = arith.constant 0 : index
    %c1 = arith.constant 1 : index
    %c0_8 = arith.constant 0 : index
    %c0_9 = arith.constant 0 : index
    %7 = vector.load %arg1[%c0_7, %c1, %c0_8, %c0_9] : memref<1x2x35x4xbf16, #tpu.memory_space<vmem>>, vector<1x1x32x4xbf16>
    %8 = vector.shape_cast %7 : vector<1x1x32x4xbf16> to vector<32x4xbf16>
    %c1_10 = arith.constant 1 : index
    %c0_11 = arith.constant 0 : index
    %c0_12 = arith.constant 0 : index
    %9 = vector.load %arg2[%c1_10, %c0_11, %c0_12] : memref<7x4x64xbf16, #tpu.memory_space<vmem>>, vector<1x4x64xbf16>
    %10 = vector.shape_cast %9 : vector<1x4x64xbf16> to vector<4x64xbf16>
    %cst_13 = arith.constant dense<0.000000e+00> : vector<32x64xf32>
    %11 = tpu.matmul %8, %10, %cst_13 {dimension_numbers = #tpu.dot_dimension_numbers<[1], [0], [0], [1], [0, 0, 1, 1], [], []>} : vector<32x4xbf16>, vector<4x64xbf16>, vector<32x64xf32> -> vector<32x64xf32>
    %12 = arith.addf %6, %11 : vector<32x64xf32>
    %c0_14 = arith.constant 0 : index
    %c0_15 = arith.constant 0 : index
    %c1_16 = arith.constant 1 : index
    %c0_17 = arith.constant 0 : index
    %13 = vector.load %arg1[%c0_14, %c0_15, %c1_16, %c0_17] : memref<1x2x35x4xbf16, #tpu.memory_space<vmem>>, vector<1x1x32x4xbf16>
    %14 = vector.shape_cast %13 : vector<1x1x32x4xbf16> to vector<32x4xbf16>
    %c2 = arith.constant 2 : index
    %c0_18 = arith.constant 0 : index
    %c0_19 = arith.constant 0 : index
    %15 = vector.load %arg2[%c2, %c0_18, %c0_19] : memref<7x4x64xbf16, #tpu.memory_space<vmem>>, vector<1x4x64xbf16>
    %16 = vector.shape_cast %15 : vector<1x4x64xbf16> to vector<4x64xbf16>
    %cst_20 = arith.constant dense<0.000000e+00> : vector<32x64xf32>
    %17 = tpu.matmul %14, %16, %cst_20 {dimension_numbers = #tpu.dot_dimension_numbers<[1], [0], [0], [1], [0, 0, 1, 1], [], []>} : vector<32x4xbf16>, vector<4x64xbf16>, vector<32x64xf32> -> vector<32x64xf32>
    %18 = arith.addf %12, %17 : vector<32x64xf32>
    %c0_21 = arith.constant 0 : index
    %c1_22 = arith.constant 1 : index
    %c1_23 = arith.constant 1 : index
    %c0_24 = arith.constant 0 : index
    %19 = vector.load %arg1[%c0_21, %c1_22, %c1_23, %c0_24] : memref<1x2x35x4xbf16, #tpu.memory_space<vmem>>, vector<1x1x32x4xbf16>
    %20 = vector.shape_cast %19 : vector<1x1x32x4xbf16> to vector<32x4xbf16>
    %c3 = arith.constant 3 : index
    %c0_25 = arith.constant 0 : index
    %c0_26 = arith.constant 0 : index
    %21 = vector.load %arg2[%c3, %c0_25, %c0_26] : memref<7x4x64xbf16, #tpu.memory_space<vmem>>, vector<1x4x64xbf16>
    %22 = vector.shape_cast %21 : vector<1x4x64xbf16> to vector<4x64xbf16>
    %cst_27 = arith.constant dense<0.000000e+00> : vector<32x64xf32>
    %23 = tpu.matmul %20, %22, %cst_27 {dimension_numbers = #tpu.dot_dimension_numbers<[1], [0], [0], [1], [0, 0, 1, 1], [], []>} : vector<32x4xbf16>, vector<4x64xbf16>, vector<32x64xf32> -> vector<32x64xf32>
    %24 = arith.addf %18, %23 : vector<32x64xf32>
    %c0_28 = arith.constant 0 : index
    %c0_29 = arith.constant 0 : index
    %c2_30 = arith.constant 2 : index
    %c0_31 = arith.constant 0 : index
    %25 = vector.load %arg1[%c0_28, %c0_29, %c2_30, %c0_31] : memref<1x2x35x4xbf16, #tpu.memory_space<vmem>>, vector<1x1x32x4xbf16>
    %26 = vector.shape_cast %25 : vector<1x1x32x4xbf16> to vector<32x4xbf16>
    %c4 = arith.constant 4 : index
    %c0_32 = arith.constant 0 : index
    %c0_33 = arith.constant 0 : index
    %27 = vector.load %arg2[%c4, %c0_32, %c0_33] : memref<7x4x64xbf16, #tpu.memory_space<vmem>>, vector<1x4x64xbf16>
    %28 = vector.shape_cast %27 : vector<1x4x64xbf16> to vector<4x64xbf16>
    %cst_34 = arith.constant dense<0.000000e+00> : vector<32x64xf32>
    %29 = tpu.matmul %26, %28, %cst_34 {dimension_numbers = #tpu.dot_dimension_numbers<[1], [0], [0], [1], [0, 0, 1, 1], [], []>} : vector<32x4xbf16>, vector<4x64xbf16>, vector<32x64xf32> -> vector<32x64xf32>
    %30 = arith.addf %24, %29 : vector<32x64xf32>
    %c0_35 = arith.constant 0 : index
    %c1_36 = arith.constant 1 : index
    %c2_37 = arith.constant 2 : index
    %c0_38 = arith.constant 0 : index
    %31 = vector.load %arg1[%c0_35, %c1_36, %c2_37, %c0_38] : memref<1x2x35x4xbf16, #tpu.memory_space<vmem>>, vector<1x1x32x4xbf16>
    %32 = vector.shape_cast %31 : vector<1x1x32x4xbf16> to vector<32x4xbf16>
    %c5 = arith.constant 5 : index
    %c0_39 = arith.constant 0 : index
    %c0_40 = arith.constant 0 : index
    %33 = vector.load %arg2[%c5, %c0_39, %c0_40] : memref<7x4x64xbf16, #tpu.memory_space<vmem>>, vector<1x4x64xbf16>
    %34 = vector.shape_cast %33 : vector<1x4x64xbf16> to vector<4x64xbf16>
    %cst_41 = arith.constant dense<0.000000e+00> : vector<32x64xf32>
    %35 = tpu.matmul %32, %34, %cst_41 {dimension_numbers = #tpu.dot_dimension_numbers<[1], [0], [0], [1], [0, 0, 1, 1], [], []>} : vector<32x4xbf16>, vector<4x64xbf16>, vector<32x64xf32> -> vector<32x64xf32>
    %36 = arith.addf %30, %35 : vector<32x64xf32>
    %c0_42 = arith.constant 0 : index
    %c0_43 = arith.constant 0 : index
    %c3_44 = arith.constant 3 : index
    %c0_45 = arith.constant 0 : index
    %37 = vector.load %arg1[%c0_42, %c0_43, %c3_44, %c0_45] : memref<1x2x35x4xbf16, #tpu.memory_space<vmem>>, vector<1x1x32x4xbf16>
    %38 = vector.shape_cast %37 : vector<1x1x32x4xbf16> to vector<32x4xbf16>
    %c6 = arith.constant 6 : index
    %c0_46 = arith.constant 0 : index
    %c0_47 = arith.constant 0 : index
    %39 = vector.load %arg2[%c6, %c0_46, %c0_47] : memref<7x4x64xbf16, #tpu.memory_space<vmem>>, vector<1x4x64xbf16>
    %40 = vector.shape_cast %39 : vector<1x4x64xbf16> to vector<4x64xbf16>
    %cst_48 = arith.constant dense<0.000000e+00> : vector<32x64xf32>
    %41 = tpu.matmul %38, %40, %cst_48 {dimension_numbers = #tpu.dot_dimension_numbers<[1], [0], [0], [1], [0, 0, 1, 1], [], []>} : vector<32x4xbf16>, vector<4x64xbf16>, vector<32x64xf32> -> vector<32x64xf32>
    %42 = arith.addf %36, %41 : vector<32x64xf32>
    %c0_49 = arith.constant 0 : index
    %c0_50 = arith.constant 0 : index
    %43 = vector.load %arg3[%c0_49, %c0_50] : memref<1x64xf32, #tpu.memory_space<vmem>>, vector<1x64xf32>
    %44 = vector.broadcast %43 : vector<1x64xf32> to vector<32x64xf32>
    %45 = arith.addf %42, %44 : vector<32x64xf32>
    %cst_51 = arith.constant 0.000000e+00 : f32
    %46 = vector.broadcast %cst_51 : f32 to vector<32x64xf32>
    %47 = arith.maximumf %45, %46 : vector<32x64xf32>
    %48 = arith.truncf %47 : vector<32x64xf32> to vector<32x64xbf16>
    %c0_52 = arith.constant 0 : index
    %c0_53 = arith.constant 0 : index
    %c0_54 = arith.constant 0 : index
    %49 = vector.load %arg4[%c0_52, %c0_53, %c0_54] : memref<1x32x64xbf16, #tpu.memory_space<vmem>>, vector<1x32x64xbf16>
    %50 = vector.shape_cast %49 : vector<1x32x64xbf16> to vector<32x64xbf16>
    %51 = vector.shape_cast %48 : vector<32x64xbf16> to vector<1x32x64xbf16>
    tpu.vector_store %arg4[%c0_52, %c0_53, %c0_54], %51 {strides = array<i32>} : memref<1x32x64xbf16, #tpu.memory_space<vmem>>, vector<1x32x64xbf16>,
    return
  }
  func.func @transform_0(%arg0: i32) -> (i32, i32, i32, i32) {
    %c0_i32 = arith.constant 0 : i32
    %c0_i32_0 = arith.constant 0 : i32
    %c0_i32_1 = arith.constant 0 : i32
    %c0_i32_2 = arith.constant 0 : i32
    return %arg0, %c0_i32, %c0_i32_0, %c0_i32_1 : i32, i32, i32, i32
  }
  func.func @transform_1(%arg0: i32) -> (i32, i32, i32) {
    %c0_i32 = arith.constant 0 : i32
    %c0_i32_0 = arith.constant 0 : i32
    %c0_i32_1 = arith.constant 0 : i32
    %c0_i32_2 = arith.constant 0 : i32
    return %c0_i32, %c0_i32_0, %c0_i32_1 : i32, i32, i32
  }
  func.func @transform_2(%arg0: i32) -> (i32, i32) {
    %c0_i32 = arith.constant 0 : i32
    %c0_i32_0 = arith.constant 0 : i32
    %c0_i32_1 = arith.constant 0 : i32
    return %c0_i32, %c0_i32_0 : i32, i32
  }
  func.func @transform_3(%arg0: i32) -> (i32, i32, i32) {
    %c0_i32 = arith.constant 0 : i32
    %c0_i32_0 = arith.constant 0 : i32
    %c0_i32_1 = arith.constant 0 : i32
    return %arg0, %c0_i32, %c0_i32_0 : i32, i32, i32
  }
}

</mosaic_0001>

<bundles_post_ra>
// kernel: tpu_custom_call.1
= control target key start
LH: loop header
LB: loop body
LE: loop exit
PB: predicated region body
PF: predicated region fallthrough
CT: control target
= control target key end

     0   :  { %8 = vsyncpa [#allocation3], 0  ;;  %s1345_s0 = inlined_call_operand.vmem [shape: bf16[2,2,35,4], index: 0, kind: input, shape index: {}]   ;;  %s1346_s1 = inlined_call_operand.vmem [shape: bf16[7,4,64], index: 1, kind: input, shape index: {}]   ;;  %s1347_s2 = inlined_call_operand.vmem [shape: f32[1,64], index: 2, kind: input, shape index: {}]   ;;  %s1348_s3 = inlined_call_operand.hbm [shape: bf16[2,32,64], index: 3, kind: output, shape index: {}]  }
   0x1   :  { %10 = vsyncpa [#allocation3 + $0x1], 0  ;;  %s1148_s12 = smov 0   ;;  %s1150_s13 = smov 0  }
   0x2   :  { %s1152_s14 = smov 0   ;;  %s1154_s15 = smov 0  }
   0x3 LB: > { %s1169_s16 = sadd.s32 4294967295, %s1123_s15   ;;  %s874_s17 = sadd.s32 4294967294, %s1123_s15   ;;  %s1123_s15 = sphi %s1154_s15, %s1354_s15   ;;  %s1119_s14 = sphi %s1152_s14, %s1353_s14   ;;  %s1115_s13 = sphi %s1150_s13, %s1352_s13   ;;  %s1111_s12 = sphi %s1148_s12, %s1351_s12  }
   0x4   : > { %s1173_s18 = sadd.s32 1, %s1123_s15   ;;  %s91_s19 = sadd.s32 1, %s1119_s14 }
   0x5   : > { %s88_s20 = ssub.s32 %s1123_s15, %s1173_s18  ;;  %p101_p0 = scmp.ne.s32.totalorder %s1119_s14, %s1115_s13 }
   0x6   : > { %p89_p1 = scmp.eq.s32.totalorder %s88_s20, 0  ;;  %p102_p2 = scmp.eq.s32.totalorder %s1169_s16, 1 }
   0x7   : > { %p107_p3 = scmp.ne.s32.totalorder %s1115_s13, %s1111_s12  ;;  %p108_p4 = scmp.eq.s32.totalorder %s874_s17, 1 }
   0x8   : > { %s1184_s21 = scalar_select %p89_p1, %s1119_s14, %s91_s19  }
   0x9   : > { %p1186_p5 = por %p102_p2, %p101_p0  ;;  %p1190_p6 = por %p108_p4, %p107_p3 }
   0xa   : > { %p877_p7 = scmp.ge.s32.totalorder %s1123_s15, 1  ;;  %p140_p8 = scmp.lt.s32.totalorder %s1123_s15, 3 }
   0xc   : > { %p141_p9 = pnand %p877_p7, %p140_p8 }
   0xd   : > { %p164_p10 = scmp.lt.s32.totalorder (!%p141_p9), %s1169_s16, 1  ;;  %s161_s25 = sand.u32 (!%p141_p9), 1, %s1115_s13  }
   0xe   : > { %144 = sbr.rel (%p141_p9) target bundleno = 274 (0x112), region = 32  ;;  %s878_s28 = sshll.u32 (!%p141_p9), %s161_s25, 4 }
   0xf   : > { %s163_s29 = scalar_lea.vmem (!%p141_p9), [#allocation2], %s878_s28 }
  0x10   : > { %s812_s4 = sshll.u32 (!%p141_p9), %s163_s29, 4  ;;  %s1299_s4 = int_to_ptr.vmem [resolvable:$true] %s812_s4 }
  0x11   : > { %s1063_s8 = scalar_lea.vmem (!%p141_p9), %s1299_s4, 256 }
  0x12   : > { %p1064_p11 = scmp.ne.s32.totalorder (!%p141_p9), %s1299_s4, %s1063_s8 }
  0x13   : > { %v884_v0 = vld [vmem:[%s1346_s1 + $0x2] sm:$0x3]  ;;  %vm199_vm0 = vcmask 1041408   ;;  %v174_v1 = vld [vmem:[%s1346_s1] sm:$0x3]  ;;  %s165_s30 = scalar_select %p164_p10, %s1169_s16, 1 }
  0x14   : > { %1001 = vmatprep.subr.msk.bf16.mxu0 %vm199_vm0, %v884_v0  ;;  %v201_v2 = vsel %vm199_vm0, %v884_v0, 0  ;;  %1002 = vmatprep.subr.msk.bf16.mxu1 %vm199_vm0, %v174_v1  ;;  %v269_v3 = vsel %vm199_vm0, %v174_v1, 0  ;;  %v893_v4 = vld [vmem:[%s1346_s1 + $0x4] sm:$0x3]  ;;  %v904_v5 = vld [vmem:[%s1346_s1 + $0x6] sm:$0x3]  ;;  %p1065_p12 = pnand %p1064_p11, %p1186_p5 }
  0x15   : > { %960 = vmatpush3.bf16.msra.mxu0 %v201_v2  ;;  %966 = vmatpush3.bf16.msra.mxu1 %v269_v3  ;;  %s1008_s6 = smul.u32 40, %s165_s30  ;;  %vm192_vm1 = vcmask 31744   ;;  %v910_v8 = vld [vmem:[%s1346_s1 + $0x8] sm:$0x3]  ;;  %v368_v10 = vsel %vm199_vm0, %v893_v4, 0  ;;  %v470_v13 = vsel %vm199_vm0, %v904_v5, 0 }
  0x16   : > { %1003 = vmatprep.subr.msk.bf16.mxu0 %vm199_vm0, %v893_v4  ;;  %1004 = vmatprep.subr.msk.bf16.mxu1 %vm199_vm0, %v904_v5  ;;  %vm340_vm2 = vsmask.f32 7424  ;;  %v915_v11 = vld [vmem:[%s1346_s1 + $0xa] sm:$0x3]  ;;  %vm531_vm3 = vcmask 1046528   ;;  %v544_v27 = vsel %vm199_vm0, %v910_v8, 0  ;;  %p1066_p13 = pneg %p1065_p12 }
  0x17   : > { %s1219_s9 = scalar_lea.vmem %s1345_s0, %s1008_s6  ;;  %v617_v55 = vsel %vm199_vm0, %v915_v11, 0  ;;  %v919_v57 = vld [vmem:[%s1346_s1 + $0xc] sm:$0x3]  ;;  %vm678_vm4 = vsmask.f32 6400  ;;  %vm793_vm5 = vcmask 519168  }
  0x18   : > { %v1050_v6 = vld [vmem:[%s1219_s9 + $0x14] sm:$0xff]   ;;  %v1051_v7 = vld [vmem:[%s1219_s9] sm:$0xff]   ;;  %v1053_v12 = vld [vmem:[%s1219_s9 + $0x8] sm:$0xff]   ;;  %s937_s30 = sshll.u32 %s1169_s16, 8  ;;  %s1305_s16 = scalar_lea.sflag [#allocation3], %s161_s25 }
  0x19   : > { %961 = vmatprep.mubr.msk.bf16.mxu0 %vm192_vm1, %v1050_v6  ;;  %v1052_v9 = vld [vmem:[%s1219_s9 + $0x1c] sm:$0xff]   ;;  %967 = vmatprep.mubr.msk.bf16.mxu1 %vm192_vm1, %v1051_v7  ;;  %v321_v15 = vld [vmem:[%s1219_s9 + $0x4] sm:$0xf]  ;;  %v1240_v17 = vld [vmem:[%s1219_s9 + $0x8] sm:$0xff]   ;;  %s1297_s7 = scalar_lea.hbm %s1348_s3, %s937_s30 }
  0x1a   : > { %962 = vmatmul.mubr.msk.bf16.vlgmr.msra.gmra.mxu0 %vm192_vm1, %v1052_v9  ;;  %v320_v14 = vld [vmem:[%s1219_s9] sm:$0xf]  ;;  %968 = vmatmul.mubr.msk.bf16.vlgmr.msra.gmra.mxu1 %vm192_vm1, %v1053_v12  ;;  %v899_v18 = vld [vmem:[%s1219_s9 + $0x14] sm:$0xf]  ;;  %v900_v19 = vld [vmem:[%s1219_s9 + $0x18] sm:$0xf] }
  0x1b   : > { %972 = vmatpush3.bf16.msra.mxu0 %v368_v10  ;;  %v894_v16 = vcombine.low %v320_v14, %v321_v15  ;;  %978 = vmatpush3.bf16.msra.mxu1 %v470_v13  ;;  %v349_v22 = vshll.u32 %v1240_v17, 16  ;;  %v353_v23 = vshrl.u32 %v1240_v17, 16  ;;  %v1248_v24 = vld [vmem:[%s1219_s9 + $0x1c] sm:$0xff]   ;;  %v905_v25 = vcombine.low %v899_v18, %v900_v19  ;;  %v1058_v26 = vld [vmem:[%s1219_s9 + $0x10] ss:$0 sps:$4 sm:$0x11]  }
  0x1c   : > { %1005 = vmatprep.subr.msk.bf16.mxu0 %vm199_vm0, %v910_v8  ;;  %1006 = vmatprep.subr.msk.bf16.mxu1 %vm199_vm0, %v915_v11  ;;  %v451_v30 = vshll.u32 %v1248_v24, 16  ;;  %v455_v31 = vshrl.u32 %v1248_v24, 16  ;;  %v357_v34 = vshll.u32 %v1058_v26, 16  ;;  %v1059_v35 = vld [vmem:[%s1219_s9 + $0x24] ss:$0 sps:$4 sm:$0x11]  }
  0x1d   : > { %v342_v20 = vshrl.u32 %v894_v16, 16  ;;  %v344_v21 = vshll.u32 %v894_v16, 16  ;;  %v351_v29 = vrot.slane %v349_v22, 1  ;;  %v444_v32 = vshrl.u32 %v905_v25, 16  ;;  %v525_v39 = vld [vmem:[%s1219_s9] sm:$0xe] }
  0x1e   : > { %v446_v33 = vshll.u32 %v905_v25, 16  ;;  %v453_v38 = vrot.slane %v451_v30, 1  ;;  %v533_v40 = vrot.slane %v1240_v17, 1  ;;  %v914_v41 = vld [vmem:[%s1219_s9 + $0x14] sm:$0xe]  ;;  %v359_v43 = vrot.slane %v357_v34, 1 }
  0x1f   : > { %v346_v28 = vrot.slane %v344_v21, 1  ;;  %v355_v37 = vor.u32 %v353_v23, %v351_v29  ;;  %v459_v44 = vshll.u32 %v1059_v35, 16  ;;  %v911_v45 = vcombine.low %v525_v39, %v321_v15  ;;  %v1062_v54 = vld [vmem:[%s1219_s9 + $0x10] ss:$0 sps:$4 sm:$0x33]   ;;  %s1125_s9 = smov [#allocation2]  }
  0x20   : > { %v448_v42 = vrot.slane %v446_v33, 1  ;;  %v457_v47 = vor.u32 %v455_v31, %v453_v38  ;;  %v916_v48 = vcombine.low %v914_v41, %v900_v19  ;;  %v606_v49 = vrot.slane %v1248_v24, 1  ;;  %s1067_s10 = sshll.u32 %s1125_s9, 4  ;;  %s1068_s10 = int_to_ptr.vmem [resolvable:$false] %s1067_s10 }
  0x21   : > { %v347_v36 = vor.u32 %v346_v28, %v342_v20  ;;  %v360_v51 = vsel %vm340_vm2, %v355_v37, %v359_v43  ;;  %v461_v52 = vrot.slane %v459_v44, 1  ;;  %v532_v53 = vrot.slane %v911_v45, 1  ;;  %s1069_s11 = scalar_lea.vmem %s1068_s10, 512  ;;  %p1070_p0 = scmp.lt.s32.totalorder %s1299_s4, %s1068_s10 }
  0x22   : > { %v449_v50 = vor.u32 %v448_v42, %v444_v32  ;;  %v605_v56 = vrot.slane %v916_v48, 1  ;;  %v535_v58 = vrot.slane %v1058_v26, 1  ;;  %v680_v59 = vshrl.u32 %v911_v45, 16  ;;  %p1071_p1 = scmp.lt.s32.totalorder %s1069_s11, %s1063_s8 }
  0x23   : > { %v352_v46 = vsel %vm340_vm2, %v347_v36, %v351_v29  ;;  %v462_v61 = vsel %vm340_vm2, %v457_v47, %v461_v52  ;;  %v534_v62 = vsel %vm531_vm3, %v532_v53, %v533_v40  ;;  %v683_v63 = vshll.u32 %v911_v45, 16 }
  0x24   : > { %973 = vmatprep.mubr.msk.bf16.mxu0 %vm192_vm1, %v352_v46  ;;  %v454_v60 = vsel %vm340_vm2, %v449_v50, %v453_v38  ;;  %v607_v0 = vsel %vm531_vm3, %v605_v56, %v606_v49  ;;  %v682_v1 = vrot.slane %v680_v59, 1  ;;  %v687_v2 = vrot.slane %v353_v23, 1  ;;  %p1072_p2 = por %p1071_p1, %p1070_p0 }
  0x25   : > { %974 = vmatmul.mubr.msk.bf16.vlgmr.msra.gmra.mxu0 %vm192_vm1, %v360_v51  ;;  %979 = vmatprep.mubr.msk.bf16.mxu1 %vm192_vm1, %v454_v60  ;;  %v685_v3 = vrot.slane %v683_v63, 2  ;;  %v688_v4 = vrot.slane %v349_v22, 2  ;;  %v692_v5 = vshrl.u32 %v1062_v54, 16  ;;  %v695_v6 = vshll.u32 %v1062_v54, 16 }
  0x26   : > { %984 = vmatpush3.bf16.msra.mxu0 %v544_v27  ;;  %985 = vmatprep.mubr.msk.bf16.mxu0 %vm192_vm1, %v534_v62  ;;  %v536_v7 = vsel %vm531_vm3, %v533_v40, %v535_v58  ;;  %v608_v8 = vrot.slane %v1059_v35, 1  ;;  %v707_v13 = vsel %vm199_vm0, %v919_v57, 0  ;;  %v923_v58 = vld [vmem:[%s1347_s2] ss:$0 sm:$0xff]  ;;  %p1073_p3 = pnand %p1072_p2, %p1066_p13 }
  0x27   : > { %980 = vmatmul.mubr.msk.bf16.vlgmr.msra.gmra.mxu1 %vm192_vm1, %v462_v61  ;;  %1007 = vmatprep.subr.msk.bf16.mxu0 %vm199_vm0, %v919_v57  ;;  %v686_v9 = vor.u32 %v685_v3, %v682_v1  ;;  %v689_v10 = vor.u32 %v688_v4, %v687_v2  ;;  %v694_v11 = vrot.slane %v692_v5, 1  ;;  %v697_v12 = vrot.slane %v695_v6, 2 }
  0x28   : > { %990 = vmatpush3.bf16.msra.mxu1 %v617_v55  ;;  %991 = vmatprep.mubr.msk.bf16.mxu1 %vm192_vm1, %v607_v0  ;;  %v609_v15 = vsel %vm531_vm3, %v606_v49, %v608_v8 }
  0x29   : > { %v690_v14 = vsel %vm678_vm4, %v686_v9, %v689_v10  ;;  %v698_v16 = vor.u32 %v697_v12, %v694_v11 }
  0x2b   : > { %v699_v17 = vsel %vm678_vm4, %v689_v10, %v698_v16 }
  0x2d   : > { %986 = vmatmul.mubr.msk.bf16.vlgmr.msra.gmra.mxu0 %vm192_vm1, %v536_v7 }
  0x2e   : > { %996 = vmatpush3.bf16.msra.mxu0 %v707_v13  ;;  %997 = vmatprep.mubr.msk.bf16.mxu0 %vm192_vm1, %v690_v14 }
  0x2f   : > { %992 = vmatmul.mubr.msk.bf16.vlgmr.msra.gmra.mxu1 %vm192_vm1, %v609_v15 }
  0x35   : > { %998 = vmatmul.mubr.msk.bf16.vlgmr.msra.gmra.mxu0 %vm192_vm1, %v699_v17 }
  0xda   : > { %v963_v18 = vpop.f32.mrf.mxu0  ;;  %v969_v19 = vpop.f32.mrf.mxu1 }
  0xdb   : > { %v314_v28 = vadd.f32 %v969_v19, %v963_v18 }
  0xdc   : > { %v237_v20 = vpop.f32.mrf.mxu0  ;;  %v305_v21 = vpop.f32.mrf.mxu1 }
  0xdd   : > { %v306_v31 = vadd.f32 %v305_v21, %v237_v20 }
  0xde   : > { %v964_v22 = vpop.f32.mrf.mxu0  ;;  %v970_v23 = vpop.f32.mrf.mxu1 }
  0xdf   : > { %v317_v35 = vadd.f32 %v970_v23, %v964_v22 }
  0xe0   : > { %v240_v24 = vpop.f32.mrf.mxu0  ;;  %v308_v25 = vpop.f32.mrf.mxu1 }
  0xe1   : > { %v309_v39 = vadd.f32 %v308_v25, %v240_v24 }
  0xe5   : > { %v975_v26 = vpop.f32.mrf.mxu0 }
  0xe6   : > { %v421_v32 = vadd.f32 %v975_v26, %v314_v28 }
  0xe7   : > { %v404_v27 = vpop.f32.mrf.mxu0  ;;  %v981_v29 = vpop.f32.mrf.mxu1 }
  0xe8   : > { %v419_v36 = vadd.f32 %v404_v27, %v306_v31  ;;  %v523_v40 = vadd.f32 %v981_v29, %v421_v32 }
  0xe9   : > { %v976_v30 = vpop.f32.mrf.mxu0  ;;  %v506_v33 = vpop.f32.mrf.mxu1 }
  0xea   : > { %v422_v41 = vadd.f32 %v976_v30, %v317_v35  ;;  %v521_v44 = vadd.f32 %v506_v33, %v419_v36 }
  0xeb   : > { %v407_v34 = vpop.f32.mrf.mxu0  ;;  %v982_v37 = vpop.f32.mrf.mxu1 }
  0xec   : > { %v420_v45 = vadd.f32 %v407_v34, %v309_v39  ;;  %v524_v49 = vadd.f32 %v982_v37, %v422_v41 }
  0xed   : > { %v987_v38 = vpop.f32.mrf.mxu0  ;;  %v509_v42 = vpop.f32.mrf.mxu1 }
  0xee   : > { %v597_v46 = vadd.f32 %v987_v38, %v523_v40  ;;  %v522_v53 = vadd.f32 %v509_v42, %v420_v45 }
  0xef   : > { %v580_v43 = vpop.f32.mrf.mxu0  ;;  %v993_v47 = vpop.f32.mrf.mxu1 }
  0xf0   : > { %v595_v50 = vadd.f32 %v580_v43, %v521_v44  ;;  %v670_v54 = vadd.f32 %v993_v47, %v597_v46 }
  0xf1   : > { %v988_v48 = vpop.f32.mrf.mxu0  ;;  %v653_v51 = vpop.f32.mrf.mxu1 }
  0xf2   : > { %v598_v55 = vadd.f32 %v988_v48, %v524_v49  ;;  %v668_v59 = vadd.f32 %v653_v51, %v595_v50 }
  0xf3   : > { %v583_v52 = vpop.f32.mrf.mxu0  ;;  %v994_v56 = vpop.f32.mrf.mxu1 }
  0xf4   : > { %v596_v60 = vadd.f32 %v583_v52, %v522_v53  ;;  %v671_v63 = vadd.f32 %v994_v56, %v598_v55 }
  0xf5   : > { %v999_v57 = vpop.f32.mrf.mxu0  ;;  %v656_v2 = vpop.f32.mrf.mxu1 }
  0xf6   : > { %v760_v61 = vadd.f32 %v999_v57, %v670_v54  ;;  %v669_v4 = vadd.f32 %v656_v2, %v596_v60 }
  0xf7   : > { %v743_v62 = vpop.f32.mrf.mxu0 }
  0xf8   : > { %v771_v0 = vadd.f32 %v923_v58, %v760_v61  ;;  %v758_v1 = vadd.f32 %v743_v62, %v668_v59 }
  0xf9   : > { %v1000_v3 = vpop.f32.mrf.mxu0 }
  0xfa   : > { %v775_v5 = vmax.f32 %v771_v0, 0.0  ;;  %v769_v6 = vadd.f32 %v923_v58, %v758_v1  ;;  %v761_v7 = vadd.f32 %v1000_v3, %v671_v63 }
  0xfb   : > { %v746_v8 = vpop.f32.mrf.mxu0 }
  0xfc   : > { %v935_v9 = vpack.c.bf16 %v775_v5, %v775_v5  ;;  %v773_v10 = vmax.f32 %v769_v6, 0.0  ;;  %v772_v11 = vadd.f32 %v923_v58, %v761_v7  ;;  %v759_v12 = vadd.f32 %v746_v8, %v669_v4 }
  0xfe   : > { %796 = vst.msk [vmem:[%s163_s29 + $0x8] sm:$0xf] %vm793_vm5, %v935_v9  ;;  %v933_v13 = vpack.c.bf16 %v773_v10, %v773_v10  ;;  %v776_v14 = vmax.f32 %v772_v11, 0.0  ;;  %v770_v15 = vadd.f32 %v923_v58, %v759_v12 }
 0x100   : > { %794 = vst.msk [vmem:[%s163_s29] sm:$0xf] %vm793_vm5, %v933_v13  ;;  %v936_v16 = vpack.c.bf16 %v776_v14, %v776_v14  ;;  %v774_v17 = vmax.f32 %v770_v15, 0.0 }
 0x102   : > { %797 = vst.msk [vmem:[%s163_s29 + $0xc] sm:$0xf] %vm793_vm5, %v936_v16  ;;  %v934_v18 = vpack.c.bf16 %v774_v17, %v774_v17 }
 0x104   : > { %795 = vst.msk [vmem:[%s163_s29 + $0x4] sm:$0xf] %vm793_vm5, %v934_v18 }
 0x105   : > { %1076 = shalt.err (!%p1073_p3)
}
 0x106   : > { %s1077_s17 = scalar_lea.hbm %s1297_s7, 256  ;;  %s1081_s24 = scalar_lea.hbm %s1348_s3, 512 }
 0x107   : > { %p1078_p4 = scmp.ne.s32.totalorder %s1297_s7, %s1077_s17  ;;  %p1082_p9 = scmp.lt.s32.totalorder %s1297_s7, %s1348_s3 }
 0x108   : > { %p1083_p10 = scmp.lt.s32.totalorder %s1081_s24, %s1077_s17 }
 0x109   : > { %p1079_p7 = pnand %p1078_p4, %p1186_p5 }
 0x10a   : > { %p1084_p11 = por %p1083_p10, %p1082_p9 }
 0x10b   : > { %p1080_p8 = pneg %p1079_p7 }
 0x10d   : > { %p1085_p12 = pnand %p1084_p11, %p1080_p8 }
 0x10f   : > { %1088 = shalt.err (!%p1085_p12)
}
 0x110   : > { %s1126_s27 = smov 64   ;;  %s1127_s28 = smov 4  }
 0x111   : > { %1009 = dma.vmem_to_hbm [thread:$0]  (%p1186_p5), %s1299_s4, 256, %s1297_s7, %s1305_s16, %s1126_s27, %s1126_s27, %s1127_s28  }
 0x112 PF: > { %p1015_p13 = scmp.ge.s32.totalorder %s1123_s15, 2  ;;  %s827_s29 = sand.u32 1, %s1111_s12  }
 0x113   : > { %s828_s30 = scalar_lea.sflag [#allocation3], %s827_s29 }
 0x114   : > { %p1012_p0 = pnand %p1015_p13, %p1190_p6 }
 0x116   : > { %p1013_p1 = pneg %p1012_p0 }
 0x118   : > { %1106 = dma.done.wait (%p1013_p1), %s828_s30, 256  }
 0x119   : > { %1108 = vsyncadd (%p1013_p1), %s828_s30, 4294967040  ;;  %p13_p2 = scmp.ge.s32.totalorder %s1173_s18, 4   ;;  %s1351_s12 = smov %s1115_s13 }
 0x11a   : > { %s1352_s13 = smov %s1119_s14  ;;  %s1353_s14 = smov %s1184_s21 }
 0x11b   : > { %s1354_s15 = smov %s1173_s18  ;;  %15 = sbr.rel (!%p13_p2) target bundleno = 3 (0x3), region = 74 }
 0x120   :  { %833 = vsyncpa [#allocation3], 1 }
 0x121   :  { %835 = vsyncpa [#allocation3 + $0x1], 1 }

</bundles_post_ra>
